<compile_context>
chip_gen: v7x
topology: tpu7x:2x2x1
jax: 0.10.0
libtpu: 0.0.40
codegen_flags: <defaults>
</compile_context>

<pallas_src>
import math

import jax
import jax.numpy as jnp
from jax.experimental import pallas as pl
from jax.experimental.pallas import tpu as pltpu


# --------------------------------------------------------------------------
# Kernels
# --------------------------------------------------------------------------
def _sdpa_single_pass_kernel(q_ref, k_ref, v_ref, mask_ref, o_ref):
    """All keys fit in one block (nk == 1): plain, non-streaming softmax."""
    # Q already carries 1/sqrt(d_k); Q/K/V are bf16, accumulation is f32.
    s = jnp.einsum("gqd,gkd->gqk", q_ref[...], k_ref[...],
                   preferred_element_type=jnp.float32)          # (G, tq, S)
    s = jnp.where(mask_ref[...] != 0, -1000000000.0, s)         # masked_fill_
    m = jnp.max(s, axis=-1, keepdims=True)
    p = jnp.exp(s - m)
    l = jnp.sum(p, axis=-1, keepdims=True)
    ctx = jnp.einsum("gqk,gkd->gqd", p.astype(v_ref.dtype), v_ref[...],
                     preferred_element_type=jnp.float32)        # (G, tq, D)
    # Normalize the small (G, tq, D) accumulator, not the (S, S) P matrix.
    o_ref[...] = (ctx * pl.reciprocal(l, approx=True)).astype(o_ref.dtype)


def _sdpa_flash_kernel(q_ref, k_ref, v_ref, mask_ref, o_ref,
                       m_sc, l_sc, acc_sc):
    """Flash-style online softmax: one (G,tq,D) query block vs one (G,tk,D) KV block."""
    ki = pl.program_id(2)

    @pl.when(ki == 0)
    def _init():
        m_sc[...] = jnp.full_like(m_sc, -jnp.inf)
        l_sc[...] = jnp.zeros_like(l_sc)
        acc_sc[...] = jnp.zeros_like(acc_sc)

    s = jnp.einsum("gqd,gkd->gqk", q_ref[...], k_ref[...],
                   preferred_element_type=jnp.float32)          # (G, tq, tk)
    s = jnp.where(mask_ref[...] != 0, -1000000000.0, s)

    m_prev = m_sc[...]
    m_new = jnp.maximum(m_prev, jnp.max(s, axis=-1, keepdims=True))
    alpha = jnp.exp(m_prev - m_new)
    p = jnp.exp(s - m_new)
    l_sc[...] = alpha * l_sc[...] + jnp.sum(p, axis=-1, keepdims=True)
    acc_sc[...] = alpha * acc_sc[...] + jnp.einsum(
        "gqk,gkd->gqd", p.astype(v_ref.dtype), v_ref[...],
        preferred_element_type=jnp.float32)
    m_sc[...] = m_new

    @pl.when(ki == pl.num_programs(2) - 1)
    def _finalize():
        inv_l = pl.reciprocal(l_sc[...], approx=True)
        o_ref[...] = (acc_sc[...] * inv_l).astype(o_ref.dtype)
        # TODO(synk): for D < 128 this store is a masked partial store; packing
        # the G heads into the lane axis (acc -> (tq, G*D)) would make it
        # lane-dense at the cost of a wrapper-side transpose.


# --------------------------------------------------------------------------
# Block / budget selection helpers
# --------------------------------------------------------------------------
def _pick_tile(S, max_tile, granule=128):
    """Largest tile <= max_tile that divides S (multiple of 128 when tiling)."""
    if S <= max_tile:
        return S
    t = (max_tile // granule) * granule
    while t >= granule:
        if S % t == 0:
            return t
        t -= granule
    return S  # cannot tile cleanly; fall back to the full extent


def _largest_divisor_leq(n, cap):
    cap = int(max(1, min(n, cap)))
    for g in range(cap, 0, -1):
        if n % g == 0:
            return g
    return 1


def _vmem_capacity_bytes():
    """Physical VMEM of the current chip; conservative v7x fallback."""
    try:
        info = pltpu.get_tpu_info()
        cap = getattr(info, "vmem_capacity_bytes", None)
        if cap:
            return int(cap)
    except Exception:
        pass
    return 64 << 20  # v7x per-TensorCore VMEM (smallest across generations)


def _pick_heads_per_block(BH, nq, per_head_bytes, budget_bytes):
    """Heads fused per grid step, bounded by VMEM and megacore balance."""
    g = _largest_divisor_leq(BH, max(1, budget_bytes // max(per_head_bytes, 1)))
    # v7x megacore: prefer an even parallel extent >= 4 so neither TensorCore
    # idles on a tail; only give up head-fusion as far as needed for that.
    while g > 1:
        steps = (BH // g) * nq
        if steps >= 4 and steps % 2 == 0:
            break
        g = _largest_divisor_leq(BH, g - 1)
    return g


# --------------------------------------------------------------------------
# Public wrapper
# --------------------------------------------------------------------------
def scaled_dot_product_attention(Q, K, V, attn_mask, d_k,
                                 *, q_tile=256, kv_tile=512):
    """Q, K, V: [B, H, S, D]; attn_mask: [B, H, S, S] (True/nonzero = mask out)."""
    B, H, S, D = Q.shape
    BH = B * H
    scale = 1.0 / math.sqrt(d_k)

    # bf16 Q/K/V, cast once here (single fused pass; the scale rides along with
    # the Q cast so the kernel does no per-step Q work).
    qf = (Q.reshape(BH, S, D) * scale).astype(jnp.bfloat16)
    kf = K.reshape(BH, S, D).astype(jnp.bfloat16)
    vf = V.reshape(BH, S, D).astype(jnp.bfloat16)

    # Mask at 1 byte/element. Skip the extra HBM pass when already int8/uint8.
    mf = attn_mask.reshape(BH, S, S)
    if mf.dtype not in (jnp.int8, jnp.uint8):
        # TODO(synk): a padding mask broadcast over heads could be shipped as
        # [B, S] and broadcast via the index_map, cutting the dominant
        # O(BH*S^2) HBM stream by H*S; the generic [B,H,S,S] contract is kept.
        mf = mf.astype(jnp.int8)

    tq = _pick_tile(S, q_tile)
    tk = _pick_tile(S, kv_tile)
    nq, nk = S // tq, S // tk
    out_bytes = Q.dtype.itemsize

    # Generation-aware VMEM budget (v7x: 64 MiB, v5e/v6e: 128 MiB).
    cap = _vmem_capacity_bytes()
    block_budget = int(cap * 0.55)          # what we size blocks against
    limit_cap = int(cap * 0.75)             # hard ceiling we ask the compiler for

    single_pass = (nk == 1)
    if single_pass:
        # double-buffered: Q, K, V (bf16), mask (i8), out
        per_head = 2 * (tq * D * 2 + 2 * S * D * 2 + tq * S + tq * D * out_bytes)
    else:
        # double-buffered inputs/out + f32 m/l/acc scratch
        per_head = (2 * (tq * D * 2 + 2 * tk * D * 2 + tq * tk + tq * D * out_bytes)
                    + 2 * tq * 4 + tq * D * 4)

    G = _pick_heads_per_block(BH, nq, per_head, block_budget)
    used = G * per_head
    vmem_limit = int(min(limit_cap, max(used * 1.3 + (2 << 20), 16 << 20)))

    out_shape = jax.ShapeDtypeStruct((BH, S, D), Q.dtype)

    if single_pass:
        out = pl.pallas_call(
            _sdpa_single_pass_kernel,
            out_shape=out_shape,
            grid_spec=pltpu.PrefetchScalarGridSpec(
                num_scalar_prefetch=0,
                grid=(BH // G, nq),
                in_specs=[
                    pl.BlockSpec((G, tq, D), lambda g, qi: (g, qi, 0)),
                    pl.BlockSpec((G, S, D), lambda g, qi: (g, 0, 0)),
                    pl.BlockSpec((G, S, D), lambda g, qi: (g, 0, 0)),
                    pl.BlockSpec((G, tq, S), lambda g, qi: (g, qi, 0)),
                ],
                out_specs=pl.BlockSpec((G, tq, D), lambda g, qi: (g, qi, 0)),
            ),
            compiler_params=pltpu.CompilerParams(
                dimension_semantics=("parallel", "parallel"),
                vmem_limit_bytes=vmem_limit),
        )(qf, kf, vf, mf)
    else:
        out = pl.pallas_call(
            _sdpa_flash_kernel,
            out_shape=out_shape,
            grid_spec=pltpu.PrefetchScalarGridSpec(
                num_scalar_prefetch=0,
                grid=(BH // G, nq, nk),
                in_specs=[
                    pl.BlockSpec((G, tq, D), lambda g, qi, ki: (g, qi, 0)),
                    pl.BlockSpec((G, tk, D), lambda g, qi, ki: (g, ki, 0)),
                    pl.BlockSpec((G, tk, D), lambda g, qi, ki: (g, ki, 0)),
                    pl.BlockSpec((G, tq, tk), lambda g, qi, ki: (g, qi, ki)),
                ],
                out_specs=pl.BlockSpec((G, tq, D), lambda g, qi, ki: (g, qi, 0)),
                scratch_shapes=[
                    pltpu.VMEM((G, tq, 1), jnp.float32),   # running max m
                    pltpu.VMEM((G, tq, 1), jnp.float32),   # running denom l
                    pltpu.VMEM((G, tq, D), jnp.float32),   # output accumulator
                ],
            ),
            compiler_params=pltpu.CompilerParams(
                dimension_semantics=("parallel", "parallel", "arbitrary"),
                vmem_limit_bytes=vmem_limit),
        )(qf, kf, vf, mf)

    return out.reshape(B, H, S, D)


# --------------------------------------------------------------------------
# Reference + demo
# --------------------------------------------------------------------------
def _reference(Q, K, V, attn_mask, d_k):
    scores = jnp.einsum("bhqd,bhkd->bhqk", Q, K) / math.sqrt(d_k)
    scores = jnp.where(attn_mask, -1000000000.0, scores)
    attn = jax.nn.softmax(scores, axis=-1)
    return jnp.einsum("bhqk,bhkd->bhqd", attn, V)


if __name__ == "__main__":
    # Small shapes consistent with the module: batch=2, heads=2, seq=8, d_k=32
    B, H, S, D = 2, 2, 8, 32
    key = jax.random.PRNGKey(0)
    kq, kk, kv, km = jax.random.split(key, 4)

    Q = jax.random.normal(kq, (B, H, S, D), dtype=jnp.float32)
    K = jax.random.normal(kk, (B, H, S, D), dtype=jnp.float32)
    V = jax.random.normal(kv, (B, H, S, D), dtype=jnp.float32)
    # attn_mask: True where attention is disallowed (e.g. padding positions)
    attn_mask = jax.random.bernoulli(km, p=0.25, shape=(B, H, S, S))

    ctx = scaled_dot_product_attention(Q, K, V, attn_mask, d_k=D)
    ctx = jax.block_until_ready(ctx)

    ref = _reference(Q, K, V, attn_mask, D)
    assert ctx.shape == (B, H, S, D)
    # bf16 MXU inputs + approx reciprocal => loosened tolerance vs f32 reference
    assert jnp.max(jnp.abs(ctx - ref)) < 5e-2, "mismatch vs reference"

    print("KERNEL_OK")
</pallas_src>

<mosaic_0001>
module attributes {stable_mosaic.version = 11 : i64} {
  func.func @_sdpa_single_pass_kernel(%arg0: i32, %arg1: i32, %arg2: memref<1x8x32xbf16, #tpu.memory_space<vmem>>, %arg3: memref<1x8x32xbf16, #tpu.memory_space<vmem>>, %arg4: memref<1x8x32xbf16, #tpu.memory_space<vmem>>, %arg5: memref<1x8x8xi8, #tpu.memory_space<vmem>>, %arg6: memref<1x8x32xf32, #tpu.memory_space<vmem>>) attributes {dimension_semantics = [#tpu.dimension_semantics<parallel>, #tpu.dimension_semantics<parallel>], iteration_bounds = array<i64: 4, 1>, scalar_prefetch = 0 : i64, scratch_operands = 0 : i64, tpu.core_type = #tpu.core_type<tc>, window_params = [{transform_indices = @transform_0, window_bounds = array<i64: 1, 8, 32>}, {transform_indices = @transform_1, window_bounds = array<i64: 1, 8, 32>}, {transform_indices = @transform_2, window_bounds = array<i64: 1, 8, 32>}, {transform_indices = @transform_3, window_bounds = array<i64: 1, 8, 8>}, {transform_indices = @transform_4, window_bounds = array<i64: 1, 8, 32>}]} {
    %c0 = arith.constant 0 : index
    %c0_0 = arith.constant 0 : index
    %c0_1 = arith.constant 0 : index
    %0 = vector.load %arg2[%c0, %c0_0, %c0_1] : memref<1x8x32xbf16, #tpu.memory_space<vmem>>, vector<1x8x32xbf16>
    %c0_2 = arith.constant 0 : index
    %c0_3 = arith.constant 0 : index
    %c0_4 = arith.constant 0 : index
    %1 = vector.load %arg3[%c0_2, %c0_3, %c0_4] : memref<1x8x32xbf16, #tpu.memory_space<vmem>>, vector<1x8x32xbf16>
    "tpu.trace_start"() <{level = 10 : i32, message = "gqd,gkd->gqk"}> : () -> ()
    %cst = arith.constant dense<0.000000e+00> : vector<1x8x8xf32>
    %2 = tpu.matmul %0, %1, %cst {dimension_numbers = #tpu.dot_dimension_numbers<[2], [2], [1], [1], [0, 0, 0, 1, 1, 1], [0], [0]>} : vector<1x8x32xbf16>, vector<1x8x32xbf16>, vector<1x8x8xf32> -> vector<1x8x8xf32>
    "tpu.trace_stop"() : () -> ()
    %c0_5 = arith.constant 0 : index
    %c0_6 = arith.constant 0 : index
    %c0_7 = arith.constant 0 : index
    %3 = vector.load %arg5[%c0_5, %c0_6, %c0_7] : memref<1x8x8xi8, #tpu.memory_space<vmem>>, vector<1x8x8xi8>
    %c0_i8 = arith.constant 0 : i8
    %4 = vector.broadcast %c0_i8 : i8 to vector<1x8x8xi8>
    %5 = arith.cmpi ne, %3, %4 : vector<1x8x8xi8>
    %cst_8 = arith.constant -1.000000e+09 : f32
    %6 = vector.broadcast %cst_8 : f32 to vector<1x8x8xf32>
    %7 = arith.select %5, %6, %2 : vector<1x8x8xi1>, vector<1x8x8xf32>
    %cst_9 = arith.constant dense<0xFF800000> : vector<1x8xf32>
    %8 = vector.multi_reduction <maximumf>, %7, %cst_9 [2] : vector<1x8x8xf32> to vector<1x8xf32>
    %9 = vector.shape_cast %8 : vector<1x8xf32> to vector<1x8x1xf32>
    %10 = vector.broadcast %9 : vector<1x8x1xf32> to vector<1x8x8xf32>
    %11 = arith.subf %7, %10 : vector<1x8x8xf32>
    %12 = math.exp %11 : vector<1x8x8xf32>
    %cst_10 = arith.constant dense<0.000000e+00> : vector<1x8xf32>
    %13 = vector.multi_reduction <add>, %12, %cst_10 [2] : vector<1x8x8xf32> to vector<1x8xf32>
    %14 = vector.shape_cast %13 : vector<1x8xf32> to vector<1x8x1xf32>
    %15 = arith.truncf %12 : vector<1x8x8xf32> to vector<1x8x8xbf16>
    %c0_11 = arith.constant 0 : index
    %c0_12 = arith.constant 0 : index
    %c0_13 = arith.constant 0 : index
    %16 = vector.load %arg4[%c0_11, %c0_12, %c0_13] : memref<1x8x32xbf16, #tpu.memory_space<vmem>>, vector<1x8x32xbf16>
    "tpu.trace_start"() <{level = 10 : i32, message = "gqk,gkd->gqd"}> : () -> ()
    %cst_14 = arith.constant dense<0.000000e+00> : vector<1x8x32xf32>
    %17 = tpu.matmul %15, %16, %cst_14 {dimension_numbers = #tpu.dot_dimension_numbers<[2], [1], [1], [2], [0, 0, 0, 1, 1, 2], [0], [0]>} : vector<1x8x8xbf16>, vector<1x8x32xbf16>, vector<1x8x32xf32> -> vector<1x8x32xf32>
    "tpu.trace_stop"() : () -> ()
    %18 = tpu.reciprocal %14 {approx = true} : vector<1x8x1xf32> -> vector<1x8x1xf32>
    %19 = vector.broadcast %18 : vector<1x8x1xf32> to vector<1x8x32xf32>
    %20 = arith.mulf %17, %19 : vector<1x8x32xf32>
    %c0_15 = arith.constant 0 : index
    %c0_16 = arith.constant 0 : index
    %c0_17 = arith.constant 0 : index
    %21 = vector.load %arg6[%c0_15, %c0_16, %c0_17] : memref<1x8x32xf32, #tpu.memory_space<vmem>>, vector<1x8x32xf32>
    tpu.vector_store %arg6[%c0_15, %c0_16, %c0_17], %20 {strides = array<i32>} : memref<1x8x32xf32, #tpu.memory_space<vmem>>, vector<1x8x32xf32>,
    return
  }
  func.func @transform_0(%arg0: i32, %arg1: i32) -> (i32, i32, i32) {
    %c0_i32 = arith.constant 0 : i32
    %c0_i32_0 = arith.constant 0 : i32
    return %arg0, %arg1, %c0_i32 : i32, i32, i32
  }
  func.func @transform_1(%arg0: i32, %arg1: i32) -> (i32, i32, i32) {
    %c0_i32 = arith.constant 0 : i32
    %c0_i32_0 = arith.constant 0 : i32
    %c0_i32_1 = arith.constant 0 : i32
    return %arg0, %c0_i32, %c0_i32_0 : i32, i32, i32
  }
  func.func @transform_2(%arg0: i32, %arg1: i32) -> (i32, i32, i32) {
    %c0_i32 = arith.constant 0 : i32
    %c0_i32_0 = arith.constant 0 : i32
    %c0_i32_1 = arith.constant 0 : i32
    return %arg0, %c0_i32, %c0_i32_0 : i32, i32, i32
  }
  func.func @transform_3(%arg0: i32, %arg1: i32) -> (i32, i32, i32) {
    %c0_i32 = arith.constant 0 : i32
    %c0_i32_0 = arith.constant 0 : i32
    return %arg0, %arg1, %c0_i32 : i32, i32, i32
  }
  func.func @transform_4(%arg0: i32, %arg1: i32) -> (i32, i32, i32) {
    %c0_i32 = arith.constant 0 : i32
    %c0_i32_0 = arith.constant 0 : i32
    return %arg0, %arg1, %c0_i32 : i32, i32, i32
  }
}

</mosaic_0001>

<bundles_post_ra>
// kernel: tpu_custom_call.1
= control target key start
LH: loop header
LB: loop body
LE: loop exit
PB: predicated region body
PF: predicated region fallthrough
CT: control target
= control target key end

     0   :  { %s1202_s0 = inlined_call_operand.hbm [shape: bf16[4,8,32], index: 0, kind: input, shape index: {}]   ;;  %s1203_s1 = inlined_call_operand.hbm [shape: bf16[4,8,32], index: 1, kind: input, shape index: {}]   ;;  %s1204_s2 = inlined_call_operand.hbm [shape: bf16[4,8,32], index: 2, kind: input, shape index: {}]   ;;  %s1205_s3 = inlined_call_operand.vmem [shape: s8[4,8,8], index: 3, kind: input, shape index: {}]   ;;  %s1206_s4 = inlined_call_operand.hbm [shape: f32[4,8,32], index: 4, kind: output, shape index: {}]  }
   0x1   :  { %1214 = sst [smem:[#allocation16_spill]] %s1203_s1 }
   0x2   :  { %9 = vsyncpa [#allocation3], 0 }
   0x3   :  { %11 = vsyncpa [#allocation3 + $0x1], 0 }
   0x4   :  { %12 = vsyncpa [#allocation6], 0 }
   0x5   :  { %14 = vsyncpa [#allocation6 + $0x1], 0 }
   0x6   :  { %15 = vsyncpa [#allocation4], 0 }
   0x7   :  { %17 = vsyncpa [#allocation4 + $0x1], 0  ;;  %s929_s15 = smov 0   ;;  %s931_s16 = smov 0  }
   0x8   :  { %s933_s17 = smov 0   ;;  %s935_s18 = smov 0  }
   0x9   :  { %s937_s19 = smov 0   ;;  %s939_s20 = smov 0  }
   0xa LB: > { %1215 = sst [smem:[#allocation12_spill]] %s891_s19  ;;  %s960_s21 = sadd.s32 4294967295, %s895_s20   ;;  %s895_s20 = sphi %s939_s20, %s23_s20   ;;  %s891_s19 = sphi %s937_s19, %s1238_s19   ;;  %s887_s18 = sphi %s935_s18, %s1237_s18   ;;  %s883_s17 = sphi %s933_s17, %s1241_s17   ;;  %s879_s16 = sphi %s931_s16, %s1240_s16   ;;  %s875_s15 = sphi %s929_s15, %s1239_s15  }
   0xb   : > { %s603_s22 = sadd.s32 4294967294, %s895_s20   ;;  %s35_s23 = sadd.s32 1, %s891_s19 }
   0xc   : > { %s44_s24 = sadd.s32 1, %s883_s17  ;;  %p37_p0 = scmp.ge.s32.totalorder %s35_s23, 4 }
   0xd   : > { %p51_p1 = scmp.ne.s32.totalorder %s883_s17, %s879_s16  ;;  %p52_p2 = scmp.eq.s32.totalorder %s895_s20, 0 }
   0xe   : > { %p57_p3 = scmp.ne.s32.totalorder %s879_s16, %s875_s15  ;;  %s1243_s23 = smov (%p37_p0, %s35_s23), 0 }
   0xf   : > { %1216 = sst [smem:[#allocation13_spill]] %s1243_s23  ;;  %p972_p4 = por %p52_p2, %p51_p1 }
  0x10   : > { %p58_p5 = scmp.eq.s32.totalorder %s960_s21, 0  ;;  %s39_s26 = ssub.s32 %s891_s19, %s1243_s23 }
  0x11   : > { %p163_p6 = scmp.eq.s32.totalorder %s960_s21, 3  ;;  %p42_p7 = scmp.eq.s32.totalorder %s39_s26, 0 }
  0x12   : > { %p980_p8 = por %p58_p5, %p57_p3  ;;  %p169_p10 = scmp.eq.s32.totalorder %s603_s22, 3 }
  0x13   : > { %p984_p9 = por %p163_p6, %p51_p1  ;;  %p662_p12 = scmp.lt.s32.totalorder %s895_s20, 4 }
  0x14   : > { %s1218_s27 = scalar_select %p980_p8, 1, 0 }
  0x15   : > { %s1219_s28 = scalar_select %p984_p9, 1, 0 }
  0x16   : > { %s989_s29 = scalar_select %p42_p7, %s883_s17, %s44_s24  }
  0x17   : > { %p991_p11 = por %p169_p10, %p57_p3  ;;  %s1207_s5 = sand.u32 1, %s883_s17  }
  0x18   : > { %1220 = sst [smem:[#allocation14_spill]] %s989_s29  ;;  %s999_s6 = sshll.u32 %s1207_s5, 2 }
  0x19   : > { %s1221_s30 = scalar_select %p991_p11, 1, 0 }
  0x1a   : > { %s1002_s7 = sshll.u32 %s891_s19, 6  ;;  %p1006_p13 = pnand %p662_p12, %p972_p4 }
  0x1b   : > { %1222 = sst [smem:[#allocation15_spill]] %s1221_s30  ;;  %s208_s9 = sand.u32 1, %s895_s20  }
  0x1c   : > { %s1223_s8 = scalar_select %p1006_p13, 1, 0 }
  0x1d   : > { %s1224_s1 = sld [smem:[#allocation16_spill]]  ;;  %s212_s13 = scalar_lea.vmem [#allocation5], %s999_s6 }
  0x1e   : > { %s219_s14 = sshll.u32 %s212_s13, 4  ;;  %s1022_s22 = scalar_lea.sflag [#allocation6], %s208_s9  ;;  %s1019_s14 = int_to_ptr.vmem [resolvable:$true] %s219_s14 }
  0x1f   : > { %p1028_p3 = pneg %p1006_p13 }
  0x23   : > { %s1015_s12 = scalar_lea.hbm %s1224_s1, %s1002_s7  ;;  %s724_s11 = scalar_lea.hbm %s1224_s1, 256 }
  0x24   : > { %s719_s24 = scalar_lea.hbm %s1015_s12, 64  ;;  %p725_p6 = scmp.lt.u32.totalorder %s1015_s12, %s1224_s1 }
  0x25   : > { %p720_p2 = scmp.ne.s32.totalorder %s1015_s12, %s719_s24  ;;  %p726_p7 = scmp.lt.u32.totalorder %s724_s11, %s719_s24 }
  0x26   : > { %p728_p12 = scmp.lt.u32.totalorder %s719_s24, %s1015_s12 }
  0x27   : > { %p722_p4 = pnand %p1028_p3, %p720_p2  ;;  %p727_p10 = por %p726_p7, %p725_p6 }
  0x29   : > { %p723_p5 = pneg %p722_p4  ;;  %p729_p0 = por %p728_p12, %p727_p10 }
  0x2b   : > { %p730_p1 = pnand %p729_p0, %p723_p5 }
  0x2d   : > { %733 = shalt.err (!%p730_p1)
}
  0x2e   : > { %s734_s9 = scalar_lea.vmem %s1019_s14, 64  ;;  %s897_s26 = smov [#allocation5]  }
  0x2f   : > { %p735_p2 = scmp.ne.s32.totalorder %s1019_s14, %s734_s9  ;;  %s739_s10 = sshll.u32 %s897_s26, 4  ;;  %s740_s10 = int_to_ptr.vmem [resolvable:$false] %s739_s10 }
  0x30   : > { %s741_s5 = scalar_lea.vmem %s740_s10, 128  ;;  %p742_p9 = scmp.lt.s32.totalorder %s1019_s14, %s740_s10 }
  0x31   : > { %p737_p4 = pnand %p735_p2, %p1028_p3  ;;  %p743_p8 = scmp.lt.s32.totalorder %s741_s5, %s734_s9 }
  0x33   : > { %p738_p11 = pneg %p737_p4  ;;  %p744_p6 = por %p743_p8, %p742_p9 }
  0x35   : > { %p745_p7 = pnand %p744_p6, %p738_p11 }
  0x37   : > { %748 = shalt.err (!%p745_p7)
}
  0x38   : > { %654 = dma.hbm_to_vmem [thread:$0]  (!%p1006_p13), %s1015_s12, 64, %s1019_s14, %s1022_s22  }
  0x39   : > { %p1226_p0 = scmp.lt.s32.totalorder %s895_s20, 5  ;;  %p1227_p1 = scmp.ge.s32.totalorder %s895_s20, 1 }
  0x3a   : > { %s1064_s9 = scalar_lea.hbm %s1202_s0, %s1002_s7  ;;  %s193_s26 = scalar_lea.vmem [#allocation2], %s999_s6 }
  0x3b   : > { %p1056_p5 = pnand %p1227_p1, %p1226_p0  ;;  %s201_s10 = sshll.u32 %s193_s26, 4  ;;  %s1067_s10 = int_to_ptr.vmem [resolvable:$true] %s201_s10 }
  0x3c   : > { %s1073_s5 = scalar_lea.hbm %s1204_s2, %s1002_s7  ;;  %s1229_s1 = sand.u32 1, %s883_s17  }
  0x3d   : > { %s1228_s24 = scalar_select %p1056_p5, 1, 0 }
  0x3e   : > { %s190_s23 = scalar_lea.sflag [#allocation3], %s1229_s1  ;;  %s749_s19 = scalar_lea.hbm %s1064_s9, 64 }
  0x3f   : > { %p750_p8 = scmp.ne.s32.totalorder %s1064_s9, %s749_s19  ;;  %s754_s29 = scalar_lea.hbm %s1202_s0, 256 }
  0x40   : > { %p755_p10 = scmp.lt.u32.totalorder %s1064_s9, %s1202_s0  ;;  %p756_p12 = scmp.lt.u32.totalorder %s754_s29, %s749_s19 }
  0x41   : > { %p752_p9 = pnand %p750_p8, %p1028_p3  ;;  %p758_p4 = scmp.lt.u32.totalorder %s749_s19, %s1064_s9 }
  0x42   : > { %p757_p2 = por %p756_p12, %p755_p10 }
  0x43   : > { %p753_p11 = pneg %p752_p9 }
  0x44   : > { %p759_p6 = por %p758_p4, %p757_p2 }
  0x46   : > { %p760_p7 = pnand %p759_p6, %p753_p11 }
  0x48   : > { %763 = shalt.err (!%p760_p7)
}
  0x49   : > { %s764_s1 = scalar_lea.vmem %s1067_s10, 64  ;;  %s898_s7 = smov [#allocation2]  }
  0x4a   : > { %p765_p0 = scmp.ne.s32.totalorder %s1067_s10, %s764_s1  ;;  %s769_s12 = sshll.u32 %s898_s7, 4  ;;  %s770_s12 = int_to_ptr.vmem [resolvable:$false] %s769_s12 }
  0x4b   : > { %s771_s30 = scalar_lea.vmem %s770_s12, 128  ;;  %p772_p9 = scmp.lt.s32.totalorder %s1067_s10, %s770_s12 }
  0x4c   : > { %p767_p1 = pnand %p765_p0, %p1028_p3  ;;  %p773_p5 = scmp.lt.s32.totalorder %s771_s30, %s764_s1 }
  0x4e   : > { %p768_p8 = pneg %p767_p1  ;;  %p774_p10 = por %p773_p5, %p772_p9 }
  0x50   : > { %p775_p12 = pnand %p774_p10, %p768_p8 }
  0x52   : > { %778 = shalt.err (!%p775_p12)
}
  0x53   : > { %651 = dma.hbm_to_vmem [thread:$0]  (!%p1006_p13), %s1064_s9, 64, %s1067_s10, %s190_s23  }
  0x54   : > { %s230_s19 = scalar_lea.vmem [#allocation7], %s999_s6  ;;  %s779_s14 = scalar_lea.hbm %s1073_s5, 64 }
  0x55   : > { %s237_s29 = sshll.u32 %s230_s19, 4  ;;  %p780_p11 = scmp.ne.s32.totalorder %s1073_s5, %s779_s14  ;;  %s238_s29 = int_to_ptr.vmem [resolvable:$true] %s237_s29 }
  0x56   : > { %s784_s26 = scalar_lea.hbm %s1204_s2, 256  ;;  %p785_p4 = scmp.lt.u32.totalorder %s1073_s5, %s1204_s2 }
  0x57   : > { %p782_p5 = pnand %p780_p11, %p1028_p3  ;;  %p786_p6 = scmp.lt.u32.totalorder %s784_s26, %s779_s14 }
  0x58   : > { %p788_p0 = scmp.lt.u32.totalorder %s779_s14, %s1073_s5 }
  0x59   : > { %p783_p2 = pneg %p782_p5  ;;  %p787_p7 = por %p786_p6, %p785_p4 }
  0x5b   : > { %p789_p1 = por %p788_p0, %p787_p7 }
  0x5d   : > { %p790_p8 = pnand %p789_p1, %p783_p2 }
  0x5f   : > { %793 = shalt.err (!%p790_p8)
}
  0x60   : > { %s794_s23 = scalar_lea.vmem %s238_s29, 64  ;;  %s899_s6 = smov [#allocation7]  }
  0x61   : > { %p795_p9 = scmp.ne.s32.totalorder %s238_s29, %s794_s23  ;;  %s799_s9 = sshll.u32 %s899_s6, 4  ;;  %s800_s9 = int_to_ptr.vmem [resolvable:$false] %s799_s9 }
  0x62   : > { %s801_s10 = scalar_lea.vmem %s800_s9, 128  ;;  %p802_p11 = scmp.lt.s32.totalorder %s238_s29, %s800_s9 }
  0x63   : > { %p797_p10 = pnand %p795_p9, %p1028_p3  ;;  %p803_p5 = scmp.lt.s32.totalorder %s801_s10, %s794_s23 }
  0x65   : > { %p798_p12 = pneg %p797_p10  ;;  %p804_p13 = por %p803_p5, %p802_p11 }
  0x67   : > { %p805_p4 = pnand %p804_p13, %p798_p12 }
  0x69   : > { %808 = shalt.err (!%p805_p4)
}
  0x6a   : > { %p1230_p6 = scmp.ne.s32.totalorder %s1223_s8, 0  ;;  %p1231_p2 = scmp.ne.s32.totalorder %s1228_s24, 0 }
  0x6b   : > { %s1120_s25 = sand.u32 (!%p1231_p2), 1, %s879_s16   ;;  %p1232_p13 = scmp.ne.s32.totalorder (!%p1231_p2), %s1218_s27, 0 }
  0x6c   : > { %657 = dma.hbm_to_vmem [thread:$0]  (!%p1230_p6), %s1073_s5, 64, %s238_s29, %s1022_s22  }
  0x6d   : > { %256 = sbr.rel (%p1231_p2) target bundleno = 731 (0x2db), region = 36  ;;  %s1123_s12 = sshll.u32 (!%p1231_p2), %s1120_s25, 2 }
  0x6e   : > { %s259_s30 = scalar_lea.sflag (!%p1231_p2), [#allocation3], %s1120_s25  ;;  %s262_s19 = scalar_lea.vmem (!%p1231_p2), [#allocation2], %s1123_s12 }
  0x74   : > { %862 = dma.done.wait (%p1232_p13), %s259_s30, 64  }
  0x75   : > { %864 = vsyncadd (%p1232_p13), %s259_s30, 4294967232  ;;  %s267_s8 = sand.u32 1, %s960_s21   ;;  %s271_s24 = scalar_lea.vmem [#allocation5], %s1123_s12 }
  0x76   : > { %s268_s22 = scalar_lea.sflag [#allocation6], %s267_s8 }
  0x77   : > { %866 = dma.done.wait (%p1232_p13), %s268_s22, 128  }
  0x78   : > { %868 = vsyncadd (%p1232_p13), %s268_s22, 4294967168  ;;  %v900_v0 = vmov 0.0   ;;  %vm901_vm0 = vmmov 0   ;;  %vm334_vm1 = vcmask 261120   ;;  %v333_v1 = vld [vmem:[%s271_s24] sm:$0xf] }
  0x79   : > { %628 = vmatprep.subr.bf16.mxu0 %v900_v0  ;;  %630 = vmatprep.mubr.msk.bf16.mxu0 %vm901_vm0, %v900_v0  ;;  %v339_v2 = vsel %vm334_vm1, %v333_v1, 0  ;;  %v332_v3 = vld [vmem:[%s262_s19] sm:$0xf]  ;;  %p322_p3 = scmp.lt.s32.totalorder %s887_s18, 3  ;;  %v902_v5 = vmov 0   ;;  %vm387_vm4 = vcmask 64512  }
  0x7a   : > { %634 = vmatprep.subr.bf16.mxu1 %v900_v0  ;;  %636 = vmatprep.mubr.msk.bf16.mxu1 %vm901_vm0, %v900_v0  ;;  %vm402_vm5 = vcmask 1043456   ;;  %s280_s11 = scalar_lea.vmem [#allocation7], %s1123_s12  ;;  %s616_s13 = sshll.u32 %s1120_s25, 3 }
  0x7b   : > { %629 = vmatpush3.bf16.xpose.msra.mxu0 %v339_v2  ;;  %s323_s21 = scalar_select %p322_p3, %s887_s18, 3  ;;  %v398_v14 = vld [vmem:[%s280_s11] sm:$0xf] }
  0x7c   : > { %v404_v15 = vsel %vm402_vm5, %v398_v14, 0  ;;  %s621_s26 = sshll.u32 %s887_s18, 7  ;;  %s321_s1 = scalar_lea.vmem [#allocation8], %s616_s13 }
  0x7d   : > { %s617_s27 = sshll.u32 %s323_s21, 1  ;;  %635 = vmatpush3.bf16.msra.mxu1 %v404_v15  ;;  %s464_s7 = sshll.u32 %s321_s1, 4  ;;  %s1155_s7 = int_to_ptr.vmem [resolvable:$true] %s464_s7 }
  0x7e   : > { %s328_s14 = scalar_lea.vmem %s1205_s3, %s617_s27  ;;  %s1153_s9 = scalar_lea.hbm %s1206_s4, %s621_s26 }
  0x7f   : > { %v381_v4 = vld [vmem:[%s328_s14] sm:$0x3]  ;;  %s450_s18 = scalar_lea.sflag [#allocation4], %s1120_s25  ;;  %s809_s10 = scalar_lea.vmem %s1155_s7, 128 }
  0x80   : > { %vm382_vm2 = vnez %v381_v4  ;;  %p810_p7 = scmp.ne.s32.totalorder %s1155_s7, %s809_s10  ;;  %p1233_p0 = scmp.ne.s32.totalorder %s1219_s28, 0 }
  0x81   : > { %v383_v6 = vsel %vm382_vm2, 16843009, %v902_v5  ;;  %s903_s12 = smov [#allocation8]  }
  0x82   : > { %631 = vmatmul.mubr.msk.bf16.vlgmr.msra.gmra.mrb[0].mxu0 %vm334_vm1, %v332_v3  ;;  %v384_v7 = vunpack.c.0.s8 %v383_v6  ;;  %p811_p1 = pnand %p810_p7, %p1233_p0  ;;  %s813_s30 = sshll.u32 %s903_s12, 4  ;;  %s814_s30 = int_to_ptr.vmem [resolvable:$false] %s813_s30 }
  0x83   : > { %s815_s19 = scalar_lea.vmem %s814_s30, 256  ;;  %p816_p9 = scmp.lt.s32.totalorder %s1155_s7, %s814_s30 }
  0x84   : > { %vm385_vm3 = vcmp.ne.s32.totalorder %v384_v7, 0  ;;  %p812_p8 = pneg %p811_p1  ;;  %p817_p10 = scmp.lt.s32.totalorder %s815_s19, %s809_s10 }
  0x86   : > { %p818_p12 = por %p817_p10, %p816_p9 }
  0x88   : > { %p819_p11 = pnand %p818_p12, %p812_p8 }
 0x155   : > { %v375_v8 = vpop.f32.mrb[0].mxu0 }
 0x156   : > { %v386_v9 = vsel %vm385_vm3, -1e+09, %v375_v8  ;;  %v632_v10 = vpop.f32.mrb[1].mxu0 }
 0x157   : > { %v378_v11 = vpop.f32.mrb[2].mxu0  ;;  %v388_v12 = vsel %vm387_vm4, %v386_v9, -inf }
 0x158   : > { %389 = vmax.xlane.f32.xlu0 %v388_v12  ;;  %v633_v13 = vpop.f32.mrb[3].mxu0 }
 0x1e5   : > { %v390_v16 = vpop.xlane.xlu0 %389 }
 0x1e6   : > { %v391_v17 = vsub.f32 %v386_v9, %v390_v16 }
 0x1e8   : > { %v392_v18 = vmul.f32 1.442695, %v391_v17 }
 0x1ea   : > { %715 = vpow2.f32 %v392_v18 }
 0x1f4   : > { %v716_v19 = vpop.eup %715 }
 0x1f5   : > { %v394_v20 = vsel %vm387_vm4, %v716_v19, 0.0  ;;  %v397_v21 = vpack.c.bf16 %v716_v19, %v716_v19 }
 0x1f6   : > { %395 = vadd.xlane.f32.xlu0 %v394_v20 }
 0x1f7   : > { %637 = vmatmul.mubr.msk.bf16.vlgmr.msra.gmra.mrb[0].mxu1 %vm387_vm4, %v397_v21 }
 0x283   : > { %v396_v22 = vpop.xlane.xlu0 %395 }
 0x284   : > { %717 = vrcp.f32 %v396_v22 }
 0x28e   : > { %v718_v23 = vpop.eup %717 }
 0x2ca   : > { %v440_v24 = vpop.f32.mrb[0].mxu1 }
 0x2cb   : > { %v447_v25 = vmul.f32 %v718_v23, %v440_v24  ;;  %v638_v26 = vpop.f32.mrb[1].mxu1 }
 0x2cc   : > { %v443_v27 = vpop.f32.mrb[2].mxu1 }
 0x2cd   : > { %v639_v28 = vpop.f32.mrb[3].mxu1  ;;  %448 = vst.msk [vmem:[%s321_s1] sm:$0xff] %vm334_vm1, %v447_v25 }
 0x2ce   : > { %822 = shalt.err (!%p819_p11)
}
 0x2cf   : > { %s823_s25 = scalar_lea.hbm %s1153_s9, 128  ;;  %s827_s24 = scalar_lea.hbm %s1206_s4, 512 }
 0x2d0   : > { %p824_p5 = scmp.ne.s32.totalorder %s1153_s9, %s823_s25  ;;  %p828_p2 = scmp.lt.u32.totalorder %s1153_s9, %s1206_s4 }
 0x2d1   : > { %p829_p13 = scmp.lt.u32.totalorder %s827_s24, %s823_s25  ;;  %p831_p7 = scmp.lt.u32.totalorder %s823_s25, %s1153_s9 }
 0x2d2   : > { %p825_p4 = pnand %p824_p5, %p1233_p0 }
 0x2d3   : > { %p830_p3 = por %p829_p13, %p828_p2 }
 0x2d4   : > { %p826_p6 = pneg %p825_p4 }
 0x2d5   : > { %p832_p1 = por %p831_p7, %p830_p3 }
 0x2d7   : > { %p833_p8 = pnand %p832_p1, %p826_p6 }
 0x2d9   : > { %836 = shalt.err (!%p833_p8)
}
 0x2da   : > { %646 = dma.vmem_to_hbm [thread:$0]  (%p1233_p0), %s1155_s7, 128, %s1153_s9, %s450_s18  }
 0x2db PF: > { %s1234_s5 = sld [smem:[#allocation15_spill]]  ;;  %p663_p9 = scmp.ge.s32.totalorder %s895_s20, 2 }
 0x2dc   : > { %s476_s29 = sand.u32 1, %s875_s15  }
 0x2dd   : > { %s477_s14 = scalar_lea.sflag [#allocation4], %s476_s29 }
 0x2e1   : > { %p1235_p10 = scmp.ne.s32.totalorder %s1234_s5, 0 }
 0x2e3   : > { %p659_p12 = pnand %p663_p9, %p1235_p10 }
 0x2e5   : > { %870 = dma.done.wait (!%p659_p12), %s477_s14, 128  }
 0x2e6   : > { %872 = vsyncadd (!%p659_p12), %s477_s14, 4294967168  ;;  %s23_s20 = sadd.s32 1, %s895_s20   ;;  %s1236_s28 = sld [smem:[#allocation14_spill]] }
 0x2e7   : > { %p20_p11 = scmp.ge.s32.totalorder %s23_s20, 6   ;;  %s1237_s18 = sld [smem:[#allocation12_spill]] }
 0x2e8   : > { %s1238_s19 = sld [smem:[#allocation13_spill]]  ;;  %s1239_s15 = smov %s879_s16 }
 0x2e9   : > { %s1240_s16 = smov %s883_s17  ;;  %22 = sbr.rel (!%p20_p11) target bundleno = 10 (0xa), region = 108 }
 0x2ec   : > { %s1241_s17 = smov %s1236_s28 }
 0x2f0   :  { %482 = vsyncpa [#allocation3], 1 }
 0x2f1   :  { %484 = vsyncpa [#allocation3 + $0x1], 1 }
 0x2f2   :  { %485 = vsyncpa [#allocation6], 1 }
 0x2f3   :  { %487 = vsyncpa [#allocation6 + $0x1], 1 }
 0x2f4   :  { %488 = vsyncpa [#allocation4], 1 }
 0x2f5   :  { %490 = vsyncpa [#allocation4 + $0x1], 1 }

</bundles_post_ra>
